<compile_context>
chip_gen: v7x
topology: tpu7x:2x2x1
jax: 0.10.0
libtpu: 0.0.40
codegen_flags: <defaults>
</compile_context>

<pallas_src>
import math

import jax
import jax.numpy as jnp
from jax.experimental import pallas as pl
from jax.experimental.pallas import tpu as pltpu


def _pick_vmem_limit_bytes():
    """Per-generation scoped-VMEM budget: ~75% of physical, capped at 100 MiB."""
    cap = 128 * 1024 * 1024
    try:
        info = pltpu.get_tpu_info()
        cap = int(getattr(info, "vmem_capacity_bytes", cap) or cap)
    except Exception:
        pass
    return int(min(cap * 3 // 4, 100 * 1024 * 1024))


def _pick_q_tile(seq_len):
    if seq_len <= 512:
        return seq_len
    for t in (512, 384, 256, 128, 64, 32, 16, 8):
        if seq_len % t == 0:
            return t
    return seq_len


def _pick_heads_per_step(num_heads, head_dim):
    # Fuse heads until the output-projection contraction reaches the 256-deep
    # MXU (v6e/v7x); tiny configs collapse to one group (one grid step).
    target = max(1, 256 // max(head_dim, 1))
    hb = min(num_heads, target)
    while num_heads % hb:
        hb -= 1
    return max(hb, 1)


def bmha_forward(x, wq, wk, wv, wo, num_heads):
    """Binary MHA forward (eval mode).

    x:            (bs, S, Din) f32
    wq, wk, wv:   (H, Din) f32    (torch nn.Linear layout: out x in)
    wo:           (Din, H) f32
    Returns (out (bs, S, Din) f32, scores (bs, num_heads, S, S) bf16).
    """
    bs, S, Din = x.shape
    H = wq.shape[0]
    assert H % num_heads == 0
    hd = H // num_heads

    hb = _pick_heads_per_step(num_heads, hd)     # heads per grid step
    n_hg = num_heads // hb                       # head groups
    tq = _pick_q_tile(S)                         # q-row tile
    n_qt = S // tq
    ghd = hb * hd                                # grouped head width

    # q/k/v entries are exact integers with |.| <= Din: bf16 exact iff Din<=256.
    op_dtype = jnp.bfloat16 if Din <= 256 else jnp.float32

    def binarize(w):
        # sign with sign(0) -> +1; compare/select in f32, single cast at the end.
        return jnp.where(w >= 0, 1.0, -1.0).astype(jnp.bfloat16)

    # Pre-binarized activations (+/-1 bf16): ideally fused into x's producer.
    xs = binarize(x)                                               # (bs, S, Din)

    # Per-layer XNOR scales from the full-precision weights.
    scale_q = jnp.mean(jnp.abs(wq))
    scale_k = jnp.mean(jnp.abs(wk))
    scale_o = jnp.mean(jnp.abs(wo))
    # scale_v omitted: positive scalar on v cancels under sign(attention).
    scales = jnp.stack(
        [scale_q * scale_k / math.sqrt(hd), scale_o]).astype(jnp.float32)

    # MXU-ready, per-head-group, +/-1 bf16 weight layouts:
    #   wq_g  (n_hg, Din, ghd)      sign(Wq).T grouped
    #   wkv_g (n_hg, Din, 2*ghd)    [sign(Wk).T | sign(Wv).T] fused
    #   wo_g  (n_hg, ghd, Din)      sign(Wo).T grouped
    def group_cols(w):
        return binarize(w).T.reshape(Din, n_hg, ghd)
    wq_g = group_cols(wq).transpose(1, 0, 2)
    wkv_g = jnp.concatenate([group_cols(wk), group_cols(wv)],
                            axis=-1).transpose(1, 0, 2)
    wo_g = binarize(wo).T.reshape(n_hg, ghd, Din)

    def kernel(scales_ref, x_ref, wq_ref, wkv_ref, wo_ref,
               out_ref, scores_ref, kv_ref):
        qt = pl.program_id(1)
        hg = pl.program_id(2)

        # K/V for this head group: computed once per batch element (first q
        # tile) over the full sequence, cached in VMEM across all q tiles.
        @pl.when(qt == 0)
        def _():
            kv = jnp.dot(x_ref[0], wkv_ref[hg],
                         preferred_element_type=jnp.float32)      # (S, 2*ghd)
            kv_ref[hg] = kv.astype(kv_ref.dtype)

        # The out block (b, qt) is resident across the head-group axis:
        # zero on the first group, accumulate every group, scale on the last.
        @pl.when(hg == 0)
        def _():
            out_ref[...] = jnp.zeros_like(out_ref)

        row0 = pl.multiple_of(qt * tq, tq)
        xs_q = x_ref[0, pl.ds(row0, tq), :]                       # (tq, Din) bf16

        # Fused Q projection for all heads of the group (one MXU matmul).
        q = jnp.dot(xs_q, wq_ref[hg],
                    preferred_element_type=jnp.float32)           # (tq, ghd)
        q = q.astype(op_dtype)
        kv = kv_ref[hg]                                           # (S, 2*ghd)

        attn_parts = []
        for h in range(hb):                                       # static unroll
            q_h = q[:, h * hd:(h + 1) * hd]                       # (tq, hd)
            k_h = kv[:, h * hd:(h + 1) * hd]                      # (S, hd)
            v_h = kv[:, ghd + h * hd: ghd + (h + 1) * hd]         # (S, hd)

            # scores = (q*sq)(k*sk)^T / sqrt(hd) = (q k^T) * folded scale
            s = jax.lax.dot_general(q_h, k_h, (((1,), (1,)), ((), ())),
                                    preferred_element_type=jnp.float32)
            s = s * scales_ref[0]                                 # (tq, S)

            # numerically stable softmax; divide on the EUP
            s = s - jnp.max(s, axis=-1, keepdims=True)
            e = jnp.exp(s)
            p = e * pl.reciprocal(jnp.sum(e, axis=-1, keepdims=True),
                                  approx=True)
            # dropout(p=0.1) is identity in eval mode.
            scores_ref[0, h] = p.astype(scores_ref.dtype)         # bf16 writeback

            attn_h = jnp.dot(p.astype(op_dtype), v_h,
                             preferred_element_type=jnp.float32)  # (tq, hd)
            # binarize the output-projection input (sign(0) -> +1)
            attn_parts.append(
                jnp.where(attn_h >= 0, 1.0, -1.0).astype(jnp.bfloat16))

        attn_s = (attn_parts[0] if hb == 1
                  else jnp.concatenate(attn_parts, axis=-1))      # (tq, ghd)

        # Output binary linear: this head group's slice of the contraction.
        out_ref[0] += jnp.dot(attn_s, wo_ref[hg],
                              preferred_element_type=jnp.float32)

        @pl.when(hg == pl.num_programs(2) - 1)
        def _():
            out_ref[...] = out_ref[...] * scales_ref[1]

    out, scores = pl.pallas_call(
        kernel,
        out_shape=(
            jax.ShapeDtypeStruct((bs, S, Din), jnp.float32),
            # bf16 halves the dominant HBM writeback stream (attention probs).
            jax.ShapeDtypeStruct((bs, num_heads, S, S), jnp.bfloat16),
        ),
        grid=(bs, n_qt, n_hg),
        in_specs=[
            pl.BlockSpec(memory_space=pltpu.MemorySpace.SMEM),            # scales
            pl.BlockSpec((1, S, Din), lambda b, qt, hg: (b, 0, 0)),       # sign(x)
            # Weights fully VMEM-resident (constant index map -> one DMA ever).
            pl.BlockSpec((n_hg, Din, ghd), lambda b, qt, hg: (0, 0, 0)),      # Wq
            pl.BlockSpec((n_hg, Din, 2 * ghd), lambda b, qt, hg: (0, 0, 0)),  # Wkv
            pl.BlockSpec((n_hg, ghd, Din), lambda b, qt, hg: (0, 0, 0)),      # Wo
        ],
        out_specs=(
            pl.BlockSpec((1, tq, Din), lambda b, qt, hg: (b, qt, 0)),       # out
            pl.BlockSpec((1, hb, tq, S), lambda b, qt, hg: (b, hg, qt, 0)),  # scores
        ),
        scratch_shapes=[
            pltpu.VMEM((n_hg, S, 2 * ghd), op_dtype),   # per-group K/V cache
        ],
        compiler_params=pltpu.CompilerParams(
            dimension_semantics=("parallel", "arbitrary", "arbitrary"),
            vmem_limit_bytes=_pick_vmem_limit_bytes()),
    )(scales, xs, wq_g, wkv_g, wo_g)
    return out, scores


if __name__ == "__main__":
    # Shapes consistent with BMHA(input_dim=32, hidden_dim=32, num_heads=4).
    bs, seq, input_dim, hidden_dim, num_heads = 2, 8, 32, 32, 4

    key = jax.random.PRNGKey(0)
    kx, kq, kk, kv, ko = jax.random.split(key, 5)
    x = jax.random.normal(kx, (bs, seq, input_dim), dtype=jnp.float32)
    # PyTorch nn.Linear-style weight shapes: (out_features, in_features)
    wq = jax.random.normal(kq, (hidden_dim, input_dim), dtype=jnp.float32)
    wk = jax.random.normal(kk, (hidden_dim, input_dim), dtype=jnp.float32)
    wv = jax.random.normal(kv, (hidden_dim, input_dim), dtype=jnp.float32)
    wo = jax.random.normal(ko, (input_dim, hidden_dim), dtype=jnp.float32)

    out, scores = bmha_forward(x, wq, wk, wv, wo, num_heads)
    jax.block_until_ready((out, scores))

    assert out.shape == (bs, seq, input_dim)
    assert scores.shape == (bs, num_heads, seq, seq)
    assert bool(jnp.all(jnp.isfinite(out)))
    assert bool(jnp.all(jnp.isfinite(scores.astype(jnp.float32))))
    print("KERNEL_OK")
</pallas_src>

<mosaic_0001>
module attributes {stable_mosaic.version = 11 : i64} {
  func.func @kernel(%arg0: i32, %arg1: i32, %arg2: i32, %arg3: memref<2xf32, #tpu.memory_space<smem>>, %arg4: memref<1x8x32xbf16, #tpu.memory_space<vmem>>, %arg5: memref<1x32x32xbf16, #tpu.memory_space<vmem>>, %arg6: memref<1x32x64xbf16, #tpu.memory_space<vmem>>, %arg7: memref<1x32x32xbf16, #tpu.memory_space<vmem>>, %arg8: memref<1x8x32xf32, #tpu.memory_space<vmem>>, %arg9: memref<1x4x8x8xbf16, #tpu.memory_space<vmem>>, %arg10: memref<1x8x64xbf16, #tpu.memory_space<vmem>>) attributes {dimension_semantics = [#tpu.dimension_semantics<parallel>, #tpu.dimension_semantics<arbitrary>, #tpu.dimension_semantics<arbitrary>], iteration_bounds = array<i64: 2, 1, 1>, scalar_prefetch = 0 : i64, scratch_operands = 1 : i64, tpu.core_type = #tpu.core_type<tc>, window_params = [{transform_indices = @transform_0, window_bounds = array<i64: 2>}, {transform_indices = @transform_1, window_bounds = array<i64: 1, 8, 32>}, {pipeline_mode = #tpu.pipeline_mode<synchronous>, transform_indices = @transform_2, window_bounds = array<i64: 1, 32, 32>}, {pipeline_mode = #tpu.pipeline_mode<synchronous>, transform_indices = @transform_3, window_bounds = array<i64: 1, 32, 64>}, {pipeline_mode = #tpu.pipeline_mode<synchronous>, transform_indices = @transform_4, window_bounds = array<i64: 1, 32, 32>}, {transform_indices = @transform_5, window_bounds = array<i64: 1, 8, 32>}, {transform_indices = @transform_6, window_bounds = array<i64: 1, 4, 8, 8>}]} {
    %c0_i32 = arith.constant 0 : i32
    %0 = arith.cmpi eq, %arg1, %c0_i32 : i32
    %1 = arith.extui %0 : i1 to i32
    %c0_i32_0 = arith.constant 0 : i32
    %2 = arith.cmpi ne, %1, %c0_i32_0 : i32
    scf.if %2 {
      %c0_64 = arith.constant 0 : index
      %c0_65 = arith.constant 0 : index
      %c0_66 = arith.constant 0 : index
      %149 = vector.load %arg4[%c0_64, %c0_65, %c0_66] : memref<1x8x32xbf16, #tpu.memory_space<vmem>>, vector<1x8x32xbf16>
      %150 = vector.shape_cast %149 : vector<1x8x32xbf16> to vector<8x32xbf16>
      %151 = arith.index_cast %arg2 : i32 to index
      %c0_67 = arith.constant 0 : index
      %c0_68 = arith.constant 0 : index
      %152 = vector.load %arg6[%151, %c0_67, %c0_68] : memref<1x32x64xbf16, #tpu.memory_space<vmem>>, vector<1x32x64xbf16>
      %153 = vector.shape_cast %152 : vector<1x32x64xbf16> to vector<32x64xbf16>
      %cst_69 = arith.constant dense<0.000000e+00> : vector<8x64xf32>
      %154 = tpu.matmul %150, %153, %cst_69 {dimension_numbers = #tpu.dot_dimension_numbers<[1], [0], [0], [1], [0, 0, 1, 1], [], []>} : vector<8x32xbf16>, vector<32x64xbf16>, vector<8x64xf32> -> vector<8x64xf32>
      %155 = arith.truncf %154 : vector<8x64xf32> to vector<8x64xbf16>
      %156 = arith.index_cast %arg2 : i32 to index
      %c0_70 = arith.constant 0 : index
      %c0_71 = arith.constant 0 : index
      %157 = vector.load %arg10[%156, %c0_70, %c0_71] : memref<1x8x64xbf16, #tpu.memory_space<vmem>>, vector<1x8x64xbf16>
      %158 = vector.shape_cast %157 : vector<1x8x64xbf16> to vector<8x64xbf16>
      %159 = vector.shape_cast %155 : vector<8x64xbf16> to vector<1x8x64xbf16>
      tpu.vector_store %arg10[%156, %c0_70, %c0_71], %159 {strides = array<i32>} : memref<1x8x64xbf16, #tpu.memory_space<vmem>>, vector<1x8x64xbf16>,
    } else {
    }
    %c0_i32_1 = arith.constant 0 : i32
    %3 = arith.cmpi eq, %arg2, %c0_i32_1 : i32
    %4 = arith.extui %3 : i1 to i32
    %c0_i32_2 = arith.constant 0 : i32
    %5 = arith.cmpi ne, %4, %c0_i32_2 : i32
    scf.if %5 {
      %cst_64 = arith.constant 0.000000e+00 : f32
      %149 = vector.broadcast %cst_64 : f32 to vector<1x8x32xf32>
      %c0_65 = arith.constant 0 : index
      %c0_66 = arith.constant 0 : index
      %c0_67 = arith.constant 0 : index
      %150 = vector.load %arg8[%c0_65, %c0_66, %c0_67] : memref<1x8x32xf32, #tpu.memory_space<vmem>>, vector<1x8x32xf32>
      tpu.vector_store %arg8[%c0_65, %c0_66, %c0_67], %149 {strides = array<i32>} : memref<1x8x32xf32, #tpu.memory_space<vmem>>, vector<1x8x32xf32>,
    } else {
    }
    %c8_i32 = arith.constant 8 : i32
    %6 = arith.muli %arg1, %c8_i32 : i32
    %7 = tpu.assume_multiple %6, 8 : i32
    %c0 = arith.constant 0 : index
    %8 = arith.index_cast %7 : i32 to index
    %c0_3 = arith.constant 0 : index
    %9 = vector.load %arg4[%c0, %8, %c0_3] : memref<1x8x32xbf16, #tpu.memory_space<vmem>>, vector<1x8x32xbf16>
    %10 = vector.shape_cast %9 : vector<1x8x32xbf16> to vector<8x32xbf16>
    %11 = arith.index_cast %arg2 : i32 to index
    %c0_4 = arith.constant 0 : index
    %c0_5 = arith.constant 0 : index
    %12 = vector.load %arg5[%11, %c0_4, %c0_5] : memref<1x32x32xbf16, #tpu.memory_space<vmem>>, vector<1x32x32xbf16>
    %13 = vector.shape_cast %12 : vector<1x32x32xbf16> to vector<32x32xbf16>
    %cst = arith.constant dense<0.000000e+00> : vector<8x32xf32>
    %14 = tpu.matmul %10, %13, %cst {dimension_numbers = #tpu.dot_dimension_numbers<[1], [0], [0], [1], [0, 0, 1, 1], [], []>} : vector<8x32xbf16>, vector<32x32xbf16>, vector<8x32xf32> -> vector<8x32xf32>
    %15 = arith.truncf %14 : vector<8x32xf32> to vector<8x32xbf16>
    %16 = arith.index_cast %arg2 : i32 to index
    %c0_6 = arith.constant 0 : index
    %c0_7 = arith.constant 0 : index
    %17 = vector.load %arg10[%16, %c0_6, %c0_7] : memref<1x8x64xbf16, #tpu.memory_space<vmem>>, vector<1x8x64xbf16>
    %18 = vector.shape_cast %17 : vector<1x8x64xbf16> to vector<8x64xbf16>
    %19 = vector.extract_strided_slice %15 {offsets = [0, 0], sizes = [8, 8], strides = [1, 1]} : vector<8x32xbf16> to vector<8x8xbf16>
    %20 = vector.extract_strided_slice %18 {offsets = [0, 0], sizes = [8, 8], strides = [1, 1]} : vector<8x64xbf16> to vector<8x8xbf16>
    %21 = vector.extract_strided_slice %18 {offsets = [0, 32], sizes = [8, 8], strides = [1, 1]} : vector<8x64xbf16> to vector<8x8xbf16>
    %cst_8 = arith.constant dense<0.000000e+00> : vector<8x8xf32>
    %22 = tpu.matmul %19, %20, %cst_8 {dimension_numbers = #tpu.dot_dimension_numbers<[1], [1], [0], [0], [0, 0, 1, 0], [], []>} : vector<8x8xbf16>, vector<8x8xbf16>, vector<8x8xf32> -> vector<8x8xf32>
    %c0_9 = arith.constant 0 : index
    %23 = memref.load %arg3[%c0_9] : memref<2xf32, #tpu.memory_space<smem>>
    %24 = vector.broadcast %23 : f32 to vector<8x8xf32>
    %25 = arith.mulf %22, %24 : vector<8x8xf32>
    %cst_10 = arith.constant dense<0xFF800000> : vector<8xf32>
    %26 = vector.multi_reduction <maximumf>, %25, %cst_10 [1] : vector<8x8xf32> to vector<8xf32>
    %27 = vector.shape_cast %26 : vector<8xf32> to vector<8x1xf32>
    %28 = vector.broadcast %27 : vector<8x1xf32> to vector<8x8xf32>
    %29 = arith.subf %25, %28 : vector<8x8xf32>
    %30 = math.exp %29 : vector<8x8xf32>
    %cst_11 = arith.constant dense<0.000000e+00> : vector<8xf32>
    %31 = vector.multi_reduction <add>, %30, %cst_11 [1] : vector<8x8xf32> to vector<8xf32>
    %32 = vector.shape_cast %31 : vector<8xf32> to vector<8x1xf32>
    %33 = tpu.reciprocal %32 {approx = true} : vector<8x1xf32> -> vector<8x1xf32>
    %34 = vector.broadcast %33 : vector<8x1xf32> to vector<8x8xf32>
    %35 = arith.mulf %30, %34 : vector<8x8xf32>
    %36 = arith.truncf %35 : vector<8x8xf32> to vector<8x8xbf16>
    %c0_12 = arith.constant 0 : index
    %c0_13 = arith.constant 0 : index
    %c0_14 = arith.constant 0 : index
    %c0_15 = arith.constant 0 : index
    %37 = vector.load %arg9[%c0_12, %c0_13, %c0_14, %c0_15] : memref<1x4x8x8xbf16, #tpu.memory_space<vmem>>, vector<1x1x8x8xbf16>
    %38 = vector.shape_cast %37 : vector<1x1x8x8xbf16> to vector<8x8xbf16>
    %39 = vector.shape_cast %36 : vector<8x8xbf16> to vector<1x1x8x8xbf16>
    tpu.vector_store %arg9[%c0_12, %c0_13, %c0_14, %c0_15], %39 {strides = array<i32>} : memref<1x4x8x8xbf16, #tpu.memory_space<vmem>>, vector<1x1x8x8xbf16>,
    %40 = arith.truncf %35 : vector<8x8xf32> to vector<8x8xbf16>
    %cst_16 = arith.constant dense<0.000000e+00> : vector<8x8xf32>
    %41 = tpu.matmul %40, %21, %cst_16 {dimension_numbers = #tpu.dot_dimension_numbers<[1], [0], [0], [1], [0, 0, 1, 1], [], []>} : vector<8x8xbf16>, vector<8x8xbf16>, vector<8x8xf32> -> vector<8x8xf32>
    %cst_17 = arith.constant 0.000000e+00 : f32
    %42 = vector.broadcast %cst_17 : f32 to vector<8x8xf32>
    %43 = arith.cmpf oge, %41, %42 : vector<8x8xf32>
    %cst_18 = arith.constant 1.000000e+00 : f32
    %cst_19 = arith.constant -1.000000e+00 : f32
    %44 = vector.broadcast %cst_18 : f32 to vector<8x8xf32>
    %45 = vector.broadcast %cst_19 : f32 to vector<8x8xf32>
    %46 = arith.select %43, %44, %45 : vector<8x8xi1>, vector<8x8xf32>
    %47 = arith.truncf %46 : vector<8x8xf32> to vector<8x8xbf16>
    %48 = vector.extract_strided_slice %15 {offsets = [0, 8], sizes = [8, 8], strides = [1, 1]} : vector<8x32xbf16> to vector<8x8xbf16>
    %49 = vector.extract_strided_slice %18 {offsets = [0, 8], sizes = [8, 8], strides = [1, 1]} : vector<8x64xbf16> to vector<8x8xbf16>
    %50 = vector.extract_strided_slice %18 {offsets = [0, 40], sizes = [8, 8], strides = [1, 1]} : vector<8x64xbf16> to vector<8x8xbf16>
    %cst_20 = arith.constant dense<0.000000e+00> : vector<8x8xf32>
    %51 = tpu.matmul %48, %49, %cst_20 {dimension_numbers = #tpu.dot_dimension_numbers<[1], [1], [0], [0], [0, 0, 1, 0], [], []>} : vector<8x8xbf16>, vector<8x8xbf16>, vector<8x8xf32> -> vector<8x8xf32>
    %c0_21 = arith.constant 0 : index
    %52 = memref.load %arg3[%c0_21] : memref<2xf32, #tpu.memory_space<smem>>
    %53 = vector.broadcast %52 : f32 to vector<8x8xf32>
    %54 = arith.mulf %51, %53 : vector<8x8xf32>
    %cst_22 = arith.constant dense<0xFF800000> : vector<8xf32>
    %55 = vector.multi_reduction <maximumf>, %54, %cst_22 [1] : vector<8x8xf32> to vector<8xf32>
    %56 = vector.shape_cast %55 : vector<8xf32> to vector<8x1xf32>
    %57 = vector.broadcast %56 : vector<8x1xf32> to vector<8x8xf32>
    %58 = arith.subf %54, %57 : vector<8x8xf32>
    %59 = math.exp %58 : vector<8x8xf32>
    %cst_23 = arith.constant dense<0.000000e+00> : vector<8xf32>
    %60 = vector.multi_reduction <add>, %59, %cst_23 [1] : vector<8x8xf32> to vector<8xf32>
    %61 = vector.shape_cast %60 : vector<8xf32> to vector<8x1xf32>
    %62 = tpu.reciprocal %61 {approx = true} : vector<8x1xf32> -> vector<8x1xf32>
    %63 = vector.broadcast %62 : vector<8x1xf32> to vector<8x8xf32>
    %64 = arith.mulf %59, %63 : vector<8x8xf32>
    %65 = arith.truncf %64 : vector<8x8xf32> to vector<8x8xbf16>
    %c0_24 = arith.constant 0 : index
    %c1 = arith.constant 1 : index
    %c0_25 = arith.constant 0 : index
    %c0_26 = arith.constant 0 : index
    %66 = vector.load %arg9[%c0_24, %c1, %c0_25, %c0_26] : memref<1x4x8x8xbf16, #tpu.memory_space<vmem>>, vector<1x1x8x8xbf16>
    %67 = vector.shape_cast %66 : vector<1x1x8x8xbf16> to vector<8x8xbf16>
    %68 = vector.shape_cast %65 : vector<8x8xbf16> to vector<1x1x8x8xbf16>
    tpu.vector_store %arg9[%c0_24, %c1, %c0_25, %c0_26], %68 {strides = array<i32>} : memref<1x4x8x8xbf16, #tpu.memory_space<vmem>>, vector<1x1x8x8xbf16>,
    %69 = arith.truncf %64 : vector<8x8xf32> to vector<8x8xbf16>
    %cst_27 = arith.constant dense<0.000000e+00> : vector<8x8xf32>
    %70 = tpu.matmul %69, %50, %cst_27 {dimension_numbers = #tpu.dot_dimension_numbers<[1], [0], [0], [1], [0, 0, 1, 1], [], []>} : vector<8x8xbf16>, vector<8x8xbf16>, vector<8x8xf32> -> vector<8x8xf32>
    %cst_28 = arith.constant 0.000000e+00 : f32
    %71 = vector.broadcast %cst_28 : f32 to vector<8x8xf32>
    %72 = arith.cmpf oge, %70, %71 : vector<8x8xf32>
    %cst_29 = arith.constant 1.000000e+00 : f32
    %cst_30 = arith.constant -1.000000e+00 : f32
    %73 = vector.broadcast %cst_29 : f32 to vector<8x8xf32>
    %74 = vector.broadcast %cst_30 : f32 to vector<8x8xf32>
    %75 = arith.select %72, %73, %74 : vector<8x8xi1>, vector<8x8xf32>
    %76 = arith.truncf %75 : vector<8x8xf32> to vector<8x8xbf16>
    %77 = vector.extract_strided_slice %15 {offsets = [0, 16], sizes = [8, 8], strides = [1, 1]} : vector<8x32xbf16> to vector<8x8xbf16>
    %78 = vector.extract_strided_slice %18 {offsets = [0, 16], sizes = [8, 8], strides = [1, 1]} : vector<8x64xbf16> to vector<8x8xbf16>
    %79 = vector.extract_strided_slice %18 {offsets = [0, 48], sizes = [8, 8], strides = [1, 1]} : vector<8x64xbf16> to vector<8x8xbf16>
    %cst_31 = arith.constant dense<0.000000e+00> : vector<8x8xf32>
    %80 = tpu.matmul %77, %78, %cst_31 {dimension_numbers = #tpu.dot_dimension_numbers<[1], [1], [0], [0], [0, 0, 1, 0], [], []>} : vector<8x8xbf16>, vector<8x8xbf16>, vector<8x8xf32> -> vector<8x8xf32>
    %c0_32 = arith.constant 0 : index
    %81 = memref.load %arg3[%c0_32] : memref<2xf32, #tpu.memory_space<smem>>
    %82 = vector.broadcast %81 : f32 to vector<8x8xf32>
    %83 = arith.mulf %80, %82 : vector<8x8xf32>
    %cst_33 = arith.constant dense<0xFF800000> : vector<8xf32>
    %84 = vector.multi_reduction <maximumf>, %83, %cst_33 [1] : vector<8x8xf32> to vector<8xf32>
    %85 = vector.shape_cast %84 : vector<8xf32> to vector<8x1xf32>
    %86 = vector.broadcast %85 : vector<8x1xf32> to vector<8x8xf32>
    %87 = arith.subf %83, %86 : vector<8x8xf32>
    %88 = math.exp %87 : vector<8x8xf32>
    %cst_34 = arith.constant dense<0.000000e+00> : vector<8xf32>
    %89 = vector.multi_reduction <add>, %88, %cst_34 [1] : vector<8x8xf32> to vector<8xf32>
    %90 = vector.shape_cast %89 : vector<8xf32> to vector<8x1xf32>
    %91 = tpu.reciprocal %90 {approx = true} : vector<8x1xf32> -> vector<8x1xf32>
    %92 = vector.broadcast %91 : vector<8x1xf32> to vector<8x8xf32>
    %93 = arith.mulf %88, %92 : vector<8x8xf32>
    %94 = arith.truncf %93 : vector<8x8xf32> to vector<8x8xbf16>
    %c0_35 = arith.constant 0 : index
    %c2 = arith.constant 2 : index
    %c0_36 = arith.constant 0 : index
    %c0_37 = arith.constant 0 : index
    %95 = vector.load %arg9[%c0_35, %c2, %c0_36, %c0_37] : memref<1x4x8x8xbf16, #tpu.memory_space<vmem>>, vector<1x1x8x8xbf16>
    %96 = vector.shape_cast %95 : vector<1x1x8x8xbf16> to vector<8x8xbf16>
    %97 = vector.shape_cast %94 : vector<8x8xbf16> to vector<1x1x8x8xbf16>
    tpu.vector_store %arg9[%c0_35, %c2, %c0_36, %c0_37], %97 {strides = array<i32>} : memref<1x4x8x8xbf16, #tpu.memory_space<vmem>>, vector<1x1x8x8xbf16>,
    %98 = arith.truncf %93 : vector<8x8xf32> to vector<8x8xbf16>
    %cst_38 = arith.constant dense<0.000000e+00> : vector<8x8xf32>
    %99 = tpu.matmul %98, %79, %cst_38 {dimension_numbers = #tpu.dot_dimension_numbers<[1], [0], [0], [1], [0, 0, 1, 1], [], []>} : vector<8x8xbf16>, vector<8x8xbf16>, vector<8x8xf32> -> vector<8x8xf32>
    %cst_39 = arith.constant 0.000000e+00 : f32
    %100 = vector.broadcast %cst_39 : f32 to vector<8x8xf32>
    %101 = arith.cmpf oge, %99, %100 : vector<8x8xf32>
    %cst_40 = arith.constant 1.000000e+00 : f32
    %cst_41 = arith.constant -1.000000e+00 : f32
    %102 = vector.broadcast %cst_40 : f32 to vector<8x8xf32>
    %103 = vector.broadcast %cst_41 : f32 to vector<8x8xf32>
    %104 = arith.select %101, %102, %103 : vector<8x8xi1>, vector<8x8xf32>
    %105 = arith.truncf %104 : vector<8x8xf32> to vector<8x8xbf16>
    %106 = vector.extract_strided_slice %15 {offsets = [0, 24], sizes = [8, 8], strides = [1, 1]} : vector<8x32xbf16> to vector<8x8xbf16>
    %107 = vector.extract_strided_slice %18 {offsets = [0, 24], sizes = [8, 8], strides = [1, 1]} : vector<8x64xbf16> to vector<8x8xbf16>
    %108 = vector.extract_strided_slice %18 {offsets = [0, 56], sizes = [8, 8], strides = [1, 1]} : vector<8x64xbf16> to vector<8x8xbf16>
    %cst_42 = arith.constant dense<0.000000e+00> : vector<8x8xf32>
    %109 = tpu.matmul %106, %107, %cst_42 {dimension_numbers = #tpu.dot_dimension_numbers<[1], [1], [0], [0], [0, 0, 1, 0], [], []>} : vector<8x8xbf16>, vector<8x8xbf16>, vector<8x8xf32> -> vector<8x8xf32>
    %c0_43 = arith.constant 0 : index
    %110 = memref.load %arg3[%c0_43] : memref<2xf32, #tpu.memory_space<smem>>
    %111 = vector.broadcast %110 : f32 to vector<8x8xf32>
    %112 = arith.mulf %109, %111 : vector<8x8xf32>
    %cst_44 = arith.constant dense<0xFF800000> : vector<8xf32>
    %113 = vector.multi_reduction <maximumf>, %112, %cst_44 [1] : vector<8x8xf32> to vector<8xf32>
    %114 = vector.shape_cast %113 : vector<8xf32> to vector<8x1xf32>
    %115 = vector.broadcast %114 : vector<8x1xf32> to vector<8x8xf32>
    %116 = arith.subf %112, %115 : vector<8x8xf32>
    %117 = math.exp %116 : vector<8x8xf32>
    %cst_45 = arith.constant dense<0.000000e+00> : vector<8xf32>
    %118 = vector.multi_reduction <add>, %117, %cst_45 [1] : vector<8x8xf32> to vector<8xf32>
    %119 = vector.shape_cast %118 : vector<8xf32> to vector<8x1xf32>
    %120 = tpu.reciprocal %119 {approx = true} : vector<8x1xf32> -> vector<8x1xf32>
    %121 = vector.broadcast %120 : vector<8x1xf32> to vector<8x8xf32>
    %122 = arith.mulf %117, %121 : vector<8x8xf32>
    %123 = arith.truncf %122 : vector<8x8xf32> to vector<8x8xbf16>
    %c0_46 = arith.constant 0 : index
    %c3 = arith.constant 3 : index
    %c0_47 = arith.constant 0 : index
    %c0_48 = arith.constant 0 : index
    %124 = vector.load %arg9[%c0_46, %c3, %c0_47, %c0_48] : memref<1x4x8x8xbf16, #tpu.memory_space<vmem>>, vector<1x1x8x8xbf16>
    %125 = vector.shape_cast %124 : vector<1x1x8x8xbf16> to vector<8x8xbf16>
    %126 = vector.shape_cast %123 : vector<8x8xbf16> to vector<1x1x8x8xbf16>
    tpu.vector_store %arg9[%c0_46, %c3, %c0_47, %c0_48], %126 {strides = array<i32>} : memref<1x4x8x8xbf16, #tpu.memory_space<vmem>>, vector<1x1x8x8xbf16>,
    %127 = arith.truncf %122 : vector<8x8xf32> to vector<8x8xbf16>
    %cst_49 = arith.constant dense<0.000000e+00> : vector<8x8xf32>
    %128 = tpu.matmul %127, %108, %cst_49 {dimension_numbers = #tpu.dot_dimension_numbers<[1], [0], [0], [1], [0, 0, 1, 1], [], []>} : vector<8x8xbf16>, vector<8x8xbf16>, vector<8x8xf32> -> vector<8x8xf32>
    %cst_50 = arith.constant 0.000000e+00 : f32
    %129 = vector.broadcast %cst_50 : f32 to vector<8x8xf32>
    %130 = arith.cmpf oge, %128, %129 : vector<8x8xf32>
    %cst_51 = arith.constant 1.000000e+00 : f32
    %cst_52 = arith.constant -1.000000e+00 : f32
    %131 = vector.broadcast %cst_51 : f32 to vector<8x8xf32>
    %132 = vector.broadcast %cst_52 : f32 to vector<8x8xf32>
    %133 = arith.select %130, %131, %132 : vector<8x8xi1>, vector<8x8xf32>
    %134 = arith.truncf %133 : vector<8x8xf32> to vector<8x8xbf16>
    %135 = tpu.concatenate %47, %76, %105, %134 in 1 : vector<8x8xbf16>, vector<8x8xbf16>, vector<8x8xbf16>, vector<8x8xbf16> -> vector<8x32xbf16>
    %c0_53 = arith.constant 0 : index
    %c0_54 = arith.constant 0 : index
    %c0_55 = arith.constant 0 : index
    %136 = vector.load %arg8[%c0_53, %c0_54, %c0_55] : memref<1x8x32xf32, #tpu.memory_space<vmem>>, vector<1x8x32xf32>
    %137 = vector.shape_cast %136 : vector<1x8x32xf32> to vector<8x32xf32>
    %138 = arith.index_cast %arg2 : i32 to index
    %c0_56 = arith.constant 0 : index
    %c0_57 = arith.constant 0 : index
    %139 = vector.load %arg7[%138, %c0_56, %c0_57] : memref<1x32x32xbf16, #tpu.memory_space<vmem>>, vector<1x32x32xbf16>
    %140 = vector.shape_cast %139 : vector<1x32x32xbf16> to vector<32x32xbf16>
    %cst_58 = arith.constant dense<0.000000e+00> : vector<8x32xf32>
    %141 = tpu.matmul %135, %140, %cst_58 {dimension_numbers = #tpu.dot_dimension_numbers<[1], [0], [0], [1], [0, 0, 1, 1], [], []>} : vector<8x32xbf16>, vector<32x32xbf16>, vector<8x32xf32> -> vector<8x32xf32>
    %142 = arith.addf %137, %141 : vector<8x32xf32>
    %c0_59 = arith.constant 0 : index
    %c0_60 = arith.constant 0 : index
    %c0_61 = arith.constant 0 : index
    %143 = vector.load %arg8[%c0_59, %c0_60, %c0_61] : memref<1x8x32xf32, #tpu.memory_space<vmem>>, vector<1x8x32xf32>
    %144 = vector.shape_cast %143 : vector<1x8x32xf32> to vector<8x32xf32>
    %145 = vector.shape_cast %142 : vector<8x32xf32> to vector<1x8x32xf32>
    tpu.vector_store %arg8[%c0_59, %c0_60, %c0_61], %145 {strides = array<i32>} : memref<1x8x32xf32, #tpu.memory_space<vmem>>, vector<1x8x32xf32>,
    %c0_i32_62 = arith.constant 0 : i32
    %146 = arith.cmpi eq, %arg2, %c0_i32_62 : i32
    %147 = arith.extui %146 : i1 to i32
    %c0_i32_63 = arith.constant 0 : i32
    %148 = arith.cmpi ne, %147, %c0_i32_63 : i32
    scf.if %148 {
      %c0_64 = arith.constant 0 : index
      %c0_65 = arith.constant 0 : index
      %c0_66 = arith.constant 0 : index
      %149 = vector.load %arg8[%c0_64, %c0_65, %c0_66] : memref<1x8x32xf32, #tpu.memory_space<vmem>>, vector<1x8x32xf32>
      %c1_67 = arith.constant 1 : index
      %150 = memref.load %arg3[%c1_67] : memref<2xf32, #tpu.memory_space<smem>>
      %151 = vector.broadcast %150 : f32 to vector<1x8x32xf32>
      %152 = arith.mulf %149, %151 : vector<1x8x32xf32>
      %c0_68 = arith.constant 0 : index
      %c0_69 = arith.constant 0 : index
      %c0_70 = arith.constant 0 : index
      %153 = vector.load %arg8[%c0_68, %c0_69, %c0_70] : memref<1x8x32xf32, #tpu.memory_space<vmem>>, vector<1x8x32xf32>
      tpu.vector_store %arg8[%c0_68, %c0_69, %c0_70], %152 {strides = array<i32>} : memref<1x8x32xf32, #tpu.memory_space<vmem>>, vector<1x8x32xf32>,
    } else {
    }
    return
  }
  func.func @transform_0(%arg0: i32, %arg1: i32, %arg2: i32) -> i32 {
    %c0_i32 = arith.constant 0 : i32
    %c0_i32_0 = arith.constant 0 : i32
    return %c0_i32 : i32
  }
  func.func @transform_1(%arg0: i32, %arg1: i32, %arg2: i32) -> (i32, i32, i32) {
    %c0_i32 = arith.constant 0 : i32
    %c0_i32_0 = arith.constant 0 : i32
    %c0_i32_1 = arith.constant 0 : i32
    return %arg0, %c0_i32, %c0_i32_0 : i32, i32, i32
  }
  func.func @transform_2(%arg0: i32, %arg1: i32, %arg2: i32) -> (i32, i32, i32) {
    %c0_i32 = arith.constant 0 : i32
    %c0_i32_0 = arith.constant 0 : i32
    %c0_i32_1 = arith.constant 0 : i32
    %c0_i32_2 = arith.constant 0 : i32
    return %c0_i32, %c0_i32_0, %c0_i32_1 : i32, i32, i32
  }
  func.func @transform_3(%arg0: i32, %arg1: i32, %arg2: i32) -> (i32, i32, i32) {
    %c0_i32 = arith.constant 0 : i32
    %c0_i32_0 = arith.constant 0 : i32
    %c0_i32_1 = arith.constant 0 : i32
    %c0_i32_2 = arith.constant 0 : i32
    return %c0_i32, %c0_i32_0, %c0_i32_1 : i32, i32, i32
  }
  func.func @transform_4(%arg0: i32, %arg1: i32, %arg2: i32) -> (i32, i32, i32) {
    %c0_i32 = arith.constant 0 : i32
    %c0_i32_0 = arith.constant 0 : i32
    %c0_i32_1 = arith.constant 0 : i32
    %c0_i32_2 = arith.constant 0 : i32
    return %c0_i32, %c0_i32_0, %c0_i32_1 : i32, i32, i32
  }
  func.func @transform_5(%arg0: i32, %arg1: i32, %arg2: i32) -> (i32, i32, i32) {
    %c0_i32 = arith.constant 0 : i32
    %c0_i32_0 = arith.constant 0 : i32
    return %arg0, %arg1, %c0_i32 : i32, i32, i32
  }
  func.func @transform_6(%arg0: i32, %arg1: i32, %arg2: i32) -> (i32, i32, i32, i32) {
    %c0_i32 = arith.constant 0 : i32
    %c0_i32_0 = arith.constant 0 : i32
    return %arg0, %arg2, %arg1, %c0_i32 : i32, i32, i32, i32
  }
}

</mosaic_0001>

<bundles_post_ra>
// kernel: tpu_custom_call.1
= control target key start
LH: loop header
LB: loop body
LE: loop exit
PB: predicated region body
PF: predicated region fallthrough
CT: control target
= control target key end

     0   :  { %s2326_s0 = inlined_call_operand.hbm [shape: f32[2], index: 0, kind: input, shape index: {}]   ;;  %s2327_s1 = inlined_call_operand.hbm [shape: bf16[2,8,32], index: 1, kind: input, shape index: {}]   ;;  %s2328_s2 = inlined_call_operand.hbm [shape: bf16[1,32,32], index: 2, kind: input, shape index: {}]   ;;  %s2329_s3 = inlined_call_operand.hbm [shape: bf16[1,32,64], index: 3, kind: input, shape index: {}]   ;;  %s2330_s4 = inlined_call_operand.hbm [shape: bf16[1,32,32], index: 4, kind: input, shape index: {}]   ;;  %s2331_s5 = inlined_call_operand.hbm [shape: f32[2,8,32], index: 5, kind: output, shape index: {0}]   ;;  %s2332_s6 = inlined_call_operand.hbm [shape: bf16[2,4,8,8], index: 6, kind: output, shape index: {1}]  }
   0x1   :  { %2338 = sst [smem:[#allocation22_spill]] %s2326_s0 }
   0x2   :  { %12 = vsyncpa [#allocation6], 0 }
   0x3   :  { %13 = vsyncpa [#allocation4], 0 }
   0x4   :  { %15 = vsyncpa [#allocation4 + $0x1], 0 }
   0x5   :  { %16 = vsyncpa [#allocation9], 0 }
   0x6   :  { %17 = vsyncpa [#allocation12], 0 }
   0x7   :  { %18 = vsyncpa [#allocation5], 0 }
   0x8   :  { %20 = vsyncpa [#allocation5 + $0x1], 0 }
   0x9   :  { %21 = vsyncpa [#allocation15], 0 }
   0xa   :  { %23 = vsyncpa [#allocation15 + $0x1], 0  ;;  %s1893_s21 = smov 0   ;;  %s1895_s22 = smov 0  }
   0xb   :  { %s1897_s23 = smov 0   ;;  %s1899_s24 = smov 0  }
   0xc   :  { %s1901_s25 = smov 0   ;;  %s1903_s26 = smov 0  }
   0xd LB: > { %s1834_s27 = smov [#allocation8]   ;;  %s2333_s29 = sadd.s32 4294967295, %s1832_s26   ;;  %s1832_s26 = sphi %s1903_s26, %s29_s26   ;;  %s1828_s25 = sphi %s1901_s25, %s2360_s25   ;;  %s1824_s24 = sphi %s1899_s24, %s2359_s24   ;;  %s1820_s23 = sphi %s1897_s23, %s2358_s23   ;;  %s1816_s22 = sphi %s1895_s22, %s2357_s22   ;;  %s1812_s21 = sphi %s1893_s21, %s2356_s21  }
   0xe   : > { %s242_s28 = sshll.u32 %s1834_s27, 4  ;;  %p1288_p0 = scmp.ge.s32.totalorder %s1832_s26, 1  ;;  %s1932_s28 = int_to_ptr.vmem [resolvable:$true] %s242_s28 }
   0xf   : > { %p1927_p1 = scmp.eq.s32.totalorder %s2333_s29, 0  ;;  %p221_p2 = scmp.lt.s32.totalorder %s1832_s26, 3 }
  0x10   : > { %s1835_s9 = smov [#allocation10]   ;;  %s1579_s13 = scalar_lea.hbm %s2328_s2, 256 }
  0x11   : > { %s2339_s30 = scalar_select %p1927_p1, 1, 0 }
  0x12   : > { %p1934_p3 = pnand %p1288_p0, %p221_p2  ;;  %s255_s10 = sshll.u32 %s1835_s9, 4  ;;  %s1947_s10 = int_to_ptr.vmem [resolvable:$true] %s255_s10 }
  0x13   : > { %p1580_p7 = scmp.ne.s32.totalorder %s2328_s2, %s1579_s13  ;;  %p1586_p11 = scmp.lt.u32.totalorder %s1579_s13, %s2328_s2 }
  0x14   : > { %s2340_s7 = scalar_select %p1934_p3, 1, 0 }
  0x15   : > { %p1453_p5 = pneg %p1934_p3 }
  0x17   : > { %p1943_p6 = pnand %p1453_p5, %p1927_p1 }
  0x19   : > { %p1957_p8 = pneg %p1943_p6 }
  0x1b   : > { %p1582_p9 = pnand %p1957_p8, %p1580_p7 }
  0x1d   : > { %p1583_p10 = pneg %p1582_p9 }
  0x1f   : > { %p1588_p12 = pnand %p1586_p11, %p1583_p10 }
  0x21   : > { %1591 = shalt.err (!%p1588_p12)
}
  0x22   : > { %s1592_s19 = scalar_lea.vmem %s1932_s28, 256  ;;  %p1600_p5 = scmp.lt.s32.totalorder %s1932_s28, %s1932_s28 }
  0x23   : > { %p1593_p13 = scmp.ne.s32.totalorder %s1932_s28, %s1592_s19  ;;  %p1601_p4 = scmp.lt.s32.totalorder %s1592_s19, %s1592_s19 }
  0x25   : > { %p1595_p0 = pnand %p1593_p13, %p1957_p8  ;;  %p1602_p7 = por %p1601_p4, %p1600_p5 }
  0x27   : > { %p1596_p2 = pneg %p1595_p0 }
  0x29   : > { %p1603_p9 = pnand %p1602_p7, %p1596_p2 }
  0x2b   : > { %1606 = shalt.err (!%p1603_p9)
}
  0x2c   : > { %s1836_s20 = smov 64   ;;  %s1837_s27 = smov 4  }
  0x2d   : > { %1459 = dma.hbm_to_vmem [thread:$0]  (!%p1943_p6), %s2328_s2, 256, %s1932_s28, [#allocation9], %s1836_s20, %s1836_s20, %s1837_s27  }
  0x2e   : > { %s2343_s0 = sld [smem:[#allocation22_spill]] }
  0x34   : > { %s1607_s14 = scalar_lea.hbm %s2343_s0, 16 }
  0x35   : > { %p1608_p4 = scmp.ne.s32.totalorder %s2343_s0, %s1607_s14  ;;  %p1614_p12 = scmp.lt.u32.totalorder %s1607_s14, %s2343_s0 }
  0x37   : > { %p1610_p10 = pnand %p1608_p4, %p1957_p8 }
  0x39   : > { %p1611_p11 = pneg %p1610_p10 }
  0x3b   : > { %p1616_p13 = pnand %p1614_p12, %p1611_p11 }
  0x3d   : > { %1619 = shalt.err (!%p1616_p13)
}
  0x3e   : > { %s1838_s29 = smov [#allocation3]   ;;  %s1620_s13 = scalar_lea.hbm %s2329_s3, 256 }
  0x3f   : > { %1456 = dma.hbm_to_smem (!%p1943_p6), %s2343_s0, 16, %s1838_s29, [#allocation6]  }
  0x40   : > { %p1621_p0 = scmp.ne.s32.totalorder %s2329_s3, %s1620_s13  ;;  %p1627_p7 = scmp.lt.u32.totalorder %s1620_s13, %s2329_s3 }
  0x42   : > { %p1623_p2 = pnand %p1621_p0, %p1957_p8 }
  0x44   : > { %p1624_p5 = pneg %p1623_p2 }
  0x46   : > { %p1629_p9 = pnand %p1627_p7, %p1624_p5 }
  0x48   : > { %1632 = shalt.err (!%p1629_p9)
}
  0x49   : > { %s1633_s29 = scalar_lea.vmem %s1947_s10, 256  ;;  %p1641_p12 = scmp.lt.s32.totalorder %s1947_s10, %s1947_s10 }
  0x4a   : > { %p1634_p4 = scmp.ne.s32.totalorder %s1947_s10, %s1633_s29  ;;  %p1642_p13 = scmp.lt.s32.totalorder %s1633_s29, %s1633_s29 }
  0x4c   : > { %p1636_p10 = pnand %p1634_p4, %p1957_p8  ;;  %p1643_p0 = por %p1642_p13, %p1641_p12 }
  0x4e   : > { %p1637_p11 = pneg %p1636_p10 }
  0x50   : > { %p1644_p2 = pnand %p1643_p0, %p1637_p11 }
  0x52   : > { %1647 = shalt.err (!%p1644_p2)
}
  0x53   : > { %1462 = dma.hbm_to_vmem [thread:$0]  (!%p1943_p6), %s2329_s3, 256, %s1947_s10, [#allocation9], %s1836_s20, %s1836_s20, %s1837_s27  }
  0x54   : > { %s1839_s9 = smov [#allocation11]   ;;  %s1648_s15 = scalar_lea.hbm %s2330_s4, 256 }
  0x55   : > { %s268_s11 = sshll.u32 %s1839_s9, 4  ;;  %p1649_p5 = scmp.ne.s32.totalorder %s2330_s4, %s1648_s15  ;;  %s269_s11 = int_to_ptr.vmem [resolvable:$true] %s268_s11 }
  0x56   : > { %p1655_p4 = scmp.lt.u32.totalorder %s1648_s15, %s2330_s4 }
  0x57   : > { %p1651_p7 = pnand %p1649_p5, %p1957_p8 }
  0x59   : > { %p1652_p9 = pneg %p1651_p7 }
  0x5b   : > { %p1657_p10 = pnand %p1655_p4, %p1652_p9 }
  0x5d   : > { %1660 = shalt.err (!%p1657_p10)
}
  0x5e   : > { %s1661_s10 = scalar_lea.vmem %s269_s11, 256  ;;  %p1669_p0 = scmp.lt.s32.totalorder %s269_s11, %s269_s11 }
  0x5f   : > { %p1662_p11 = scmp.ne.s32.totalorder %s269_s11, %s1661_s10  ;;  %p1670_p2 = scmp.lt.s32.totalorder %s1661_s10, %s1661_s10 }
  0x61   : > { %p1664_p12 = pnand %p1662_p11, %p1957_p8  ;;  %p1671_p3 = por %p1670_p2, %p1669_p0 }
  0x63   : > { %p1665_p13 = pneg %p1664_p12 }
  0x65   : > { %p1672_p1 = pnand %p1671_p3, %p1665_p13 }
  0x67   : > { %1675 = shalt.err (!%p1672_p1)
}
  0x68   : > { %1465 = dma.hbm_to_vmem [thread:$0]  (!%p1943_p6), %s2330_s4, 256, %s269_s11, [#allocation12], %s1836_s20, %s1836_s20, %s1837_s27  }
  0x69   : > { %s1287_s8 = sadd.s32 4294967294, %s1832_s26   ;;  %s48_s16 = sadd.s32 1, %s1828_s25 }
  0x6a   : > { %p50_p1 = scmp.ge.s32.totalorder %s48_s16, 2  ;;  %s76_s9 = sadd.s32 1, %s1820_s23 }
  0x6b   : > { %p83_p3 = scmp.ne.s32.totalorder %s1820_s23, %s1816_s22  ;;  %p84_p8 = scmp.eq.s32.totalorder %s1832_s26, 0 }
  0x6c   : > { %s2362_s16 = smov (%p50_p1, %s48_s16), 0  ;;  %p89_p7 = scmp.ne.s32.totalorder %s1816_s22, %s1812_s21 }
  0x6d   : > { %p2052_p5 = por %p84_p8, %p83_p3  ;;  %s73_s20 = ssub.s32 %s1828_s25, %s2362_s16 }
  0x6e   : > { %s2345_s27 = sadd.s32 4294967295, %s1832_s26   ;;  %p74_p9 = scmp.eq.s32.totalorder %s73_s20, 0 }
  0x6f   : > { %p178_p6 = scmp.eq.s32.totalorder %s2345_s27, 1  ;;  %p2346_p4 = scmp.ne.s32.totalorder %s2339_s30, 0 }
  0x70   : > { %p184_p12 = scmp.eq.s32.totalorder %s1287_s8, 1  ;;  %p1481_p0 = scmp.lt.s32.totalorder %s1832_s26, 2 }
  0x71   : > { %p2064_p10 = por %p2346_p4, %p89_p7  ;;  %p2068_p11 = por %p178_p6, %p83_p3 }
  0x72   : > { %s2073_s15 = scalar_select %p74_p9, %s1820_s23, %s76_s9  }
  0x73   : > { %s2348_s13 = scalar_select %p2068_p11, 1, 0 }
  0x74   : > { %p2075_p13 = por %p184_p12, %p89_p7  ;;  %s282_s14 = sand.u32 1, %s1820_s23  }
  0x75   : > { %s1295_s18 = sshll.u32 %s1828_s25, 6  ;;  %s1294_s29 = sshll.u32 %s282_s14, 2 }
  0x76   : > { %s2349_s17 = scalar_select %p2075_p13, 1, 0 }
  0x77   : > { %s2085_s28 = scalar_lea.hbm %s2327_s1, %s1295_s18  ;;  %s286_s8 = scalar_lea.vmem [#allocation7], %s1294_s29 }
  0x78   : > { %s293_s9 = sshll.u32 %s286_s8, 4  ;;  %p2089_p2 = pnand %p1481_p0, %p2052_p5  ;;  %s2093_s9 = int_to_ptr.vmem [resolvable:$true] %s293_s9 }
  0x79   : > { %s283_s27 = scalar_lea.sflag [#allocation4], %s282_s14  ;;  %s1676_s0 = scalar_lea.hbm %s2085_s28, 64 }
  0x7a   : > { %p1677_p1 = scmp.ne.s32.totalorder %s2085_s28, %s1676_s0  ;;  %p1678_p3 = pneg %p2089_p2 }
  0x7b   : > { %s1681_s12 = scalar_lea.hbm %s2327_s1, 128  ;;  %p1682_p5 = scmp.lt.u32.totalorder %s2085_s28, %s2327_s1 }
  0x7c   : > { %p1679_p8 = pnand %p1678_p3, %p1677_p1  ;;  %p1683_p6 = scmp.lt.u32.totalorder %s1681_s12, %s1676_s0 }
  0x7d   : > { %p1685_p4 = scmp.lt.u32.totalorder %s1676_s0, %s2085_s28 }
  0x7e   : > { %p1680_p7 = pneg %p1679_p8  ;;  %p1684_p9 = por %p1683_p6, %p1682_p5 }
  0x80   : > { %p1686_p12 = por %p1685_p4, %p1684_p9 }
  0x82   : > { %p1687_p0 = pnand %p1686_p12, %p1680_p7 }
  0x84   : > { %1690 = shalt.err (!%p1687_p0)
}
  0x85   : > { %s1691_s14 = scalar_lea.vmem %s2093_s9, 64  ;;  %s1840_s8 = smov [#allocation7]  }
  0x86   : > { %p1692_p1 = scmp.ne.s32.totalorder %s2093_s9, %s1691_s14  ;;  %s1696_s18 = sshll.u32 %s1840_s8, 4  ;;  %s1697_s18 = int_to_ptr.vmem [resolvable:$false] %s1696_s18 }
  0x87   : > { %s1698_s29 = scalar_lea.vmem %s1697_s18, 128  ;;  %p1699_p11 = scmp.lt.s32.totalorder %s2093_s9, %s1697_s18 }
  0x88   : > { %p1694_p8 = pnand %p1692_p1, %p1678_p3  ;;  %p1700_p5 = scmp.lt.s32.totalorder %s1698_s29, %s1691_s14 }
  0x8a   : > { %p1695_p13 = pneg %p1694_p8  ;;  %p1701_p6 = por %p1700_p5, %p1699_p11 }
  0x8c   : > { %p1702_p9 = pnand %p1701_p6, %p1695_p13 }
  0x8e   : > { %1705 = shalt.err (!%p1702_p9)
}
  0x8f   : > { %1469 = dma.hbm_to_vmem [thread:$0]  (!%p2089_p2), %s2085_s28, 64, %s2093_s9, %s283_s27  }
  0x90   : > { %p2351_p7 = scmp.ne.s32.totalorder %s2340_s7, 0 }
  0x91   : > { %p2352_p3 = scmp.ne.s32.totalorder (!%p2351_p7), %s2339_s30, 0 }
  0x92   : > { %302 = sbr.rel (%p2351_p7) target bundleno = 1645 (0x66d), region = 40 }
  0x99   : > { %1787 = dma.done.wait (%p2352_p3), [#allocation6], 16  }
  0x9a   : > { %1789 = vsyncadd (%p2352_p3), [#allocation6], 4294967280  ;;  %s2127_s0 = sand.u32 1, %s1816_s22  }
  0x9b   : > { %s1298_s12 = sshll.u32 %s2127_s0, 2  ;;  %s309_s20 = scalar_lea.sflag [#allocation4], %s2127_s0 }
  0x9c   : > { %s312_s10 = scalar_lea.vmem [#allocation7], %s1298_s12 }
  0x9d   : > { %1791 = dma.done.wait (%p2064_p10), %s309_s20, 64  }
  0x9e   : > { %1793 = vsyncadd (%p2064_p10), %s309_s20, 4294967232 }
  0x9f   : > { %1795 = dma.done.wait (%p2352_p3), [#allocation9], 512  }
  0xa0   : > { %1797 = vsyncadd (%p2352_p3), [#allocation9], 4294966784 }
  0xa1   : > { %1799 = dma.done.wait (%p2352_p3), [#allocation12], 256  }
  0xa2   : > { %1801 = vsyncadd (%p2352_p3), [#allocation12], 4294967040 }
  0xa3   : > { %329 = sfence }
  0xa4   : > { %v1556_v0 = vld [vmem:[#allocation10] sm:$0xff]   ;;  %v1841_v1 = vmov 0.0   ;;  %v1557_v2 = vld [vmem:[#allocation10 + $0x8] sm:$0xff]   ;;  %vm1842_vm0 = vmmov 0   ;;  %v1558_v3 = vld [vmem:[#allocation8] sm:$0xff]   ;;  %vm385_vm1 = vcmask 261120  }
  0xa5   : > { %1359 = vmatprep.subr.bf16.mxu0 %v1841_v1  ;;  %1367 = vmatprep.subr.bf16.mxu1 %v1841_v1  ;;  %v1559_v4 = vld [vmem:[#allocation8 + $0x8] sm:$0xff]   ;;  %v365_v5 = vld [vmem:[%s312_s10] sm:$0xf]  ;;  %vm432_vm2 = vcmask 519168   ;;  %vm513_vm3 = vcmask 64512   ;;  %s1843_s30 = smov 112  }
  0xa6   : > { %1360 = vmatpush3.bf16.msra.mxu0 %v1556_v0  ;;  %1363 = vmatprep.mubr.msk.bf16.mxu0 %vm1842_vm0, %v1841_v1  ;;  %v445_v6 = vld [vmem:[%s312_s10] sm:$0xf]  ;;  %s1844_s7 = smov 120   ;;  %s1845_s11 = smov 104   ;;  %vm585_vm4 = vcmask 1043456   ;;  %vm575_vm5 = vcmask 60416  }
  0xa7   : > { %1361 = vmatprep.subr.bf16.mxu0 %v1841_v1  ;;  %1371 = vmatprep.mubr.msk.bf16.mxu1 %vm1842_vm0, %v1841_v1  ;;  %s560_s28 = sld [smem:[#allocation3]]  ;;  %s1846_s9 = smov 96   ;;  %vm999_vm10 = vcmask 130048   ;;  %vm1002_vm11 = vcmask 195584  }
  0xa8   : > { %1368 = vmatpush3.bf16.msra.mxu1 %v1558_v3  ;;  %s1847_s27 = smov 80   ;;  %s1848_s19 = smov 72  }
  0xa9   : > { %1369 = vmatprep.subr.bf16.mxu1 %v1841_v1  ;;  %s1303_s14 = sshll.u32 %s2127_s0, 4  ;;  %s1849_s8 = smov 88  }
  0xaa   : > { %1362 = vmatpush3.bf16.msra.mxu0 %v1557_v2  ;;  %s2199_s18 = scalar_lea.vmem [#allocation14], %s1303_s14  ;;  %s1851_s29 = smov 8  }
  0xab   : > { %1375 = vmatprep.subr.bf16.mxu0 %v1841_v1  ;;  %s1302_s12 = sshll.u32 %s2127_s0, 3  ;;  %s1852_s10 = smov 16  }
  0xac   : > { %1370 = vmatpush3.bf16.msra.mxu1 %v1559_v4  ;;  %s2226_s20 = scalar_lea.vmem [#allocation13], %s1302_s12  ;;  %p2353_p11 = scmp.ne.s32.totalorder %s2348_s13, 0 }
  0xad   : > { %1364 = vmatmul.mubr.msk.bf16.vlgmr.msra.gmra.mrb[0].mxu0 %vm385_vm1, %v365_v5  ;;  %1381 = vmatprep.subr.bf16.mxu1 %v1841_v1  ;;  %v561_v29 = vstv %s560_s28  ;;  %439 = vst.msk [vmem:[%s2226_s20] sm:$0xff] %vm385_vm1, %v1841_v1 }
  0xae   : > { %1377 = vmatprep.mubr.msk.bf16.mxu0 %vm1842_vm0, %v1841_v1 }
  0xaf   : > { %1372 = vmatmul.mubr.msk.bf16.vlgmr.msra.gmra.mrb[0].mxu1 %vm385_vm1, %v445_v6 }
  0xb0   : > { %1383 = vmatprep.mubr.msk.bf16.mxu1 %vm1842_vm0, %v1841_v1 }
 0x180   : > { %v423_v7 = vpop.f32.mrb[0].mxu0 }
 0x181   : > { %v429_v8 = vpack.c.bf16 %v423_v7, %v423_v7  ;;  %v1365_v9 = vpop.f32.mrb[1].mxu0 }
 0x182   : > { %v426_v10 = vpop.f32.mrb[2].mxu0  ;;  %v503_v11 = vpop.f32.mrb[0].mxu1 }
 0x183   : > { %433 = vst.msk [vmem:[#allocation2] sm:$0xf] %vm432_vm2, %v429_v8  ;;  %v1366_v12 = vpop.f32.mrb[3].mxu0  ;;  %v1373_v13 = vpop.f32.mrb[1].mxu1  ;;  %v509_v19 = vpack.c.bf16 %v503_v11, %v503_v11 }
 0x184   : > { %v506_v14 = vpop.f32.mrb[2].mxu1 }
 0x185   : > { %v1374_v15 = vpop.f32.mrb[3].mxu1 }
 0x18a   : > { %v512_v16 = vld [vmem:[#allocation2] sm:$0xf] }
 0x18b   : > { %v518_v17 = vsel %vm513_vm3, %v512_v16, 0  ;;  %v2160_v18 = vcombine.low %v512_v16, %v512_v16 }
 0x18c   : > { %1376 = vmatpush3.bf16.xpose.msra.mxu0 %v518_v17 }
 0x18d   : > { %753 = vrot.lane.b32.xlu1 %v2160_v18, %s1843_s30  ;;  %635 = vrot.lane.b32.xlu0 %v2160_v18, %s1844_s7 }
 0x18e   : > { %1387 = vmatprep.subr.bf16.mxu0 %v1841_v1 }
 0x191   : > { %751 = vrot.lane.b32.xlu1 %v509_v19, %s1843_s30  ;;  %633 = vrot.lane.b32.xlu0 %v509_v19, %s1844_s7  ;;  %s1853_s30 = smov 24   ;;  %s1333_s7 = sshll.u32 %s1824_s24, 8 }
 0x193   : > { %1378 = vmatmul.mubr.msk.bf16.vlgmr.msra.gmra.mrb[4].mxu0 %vm513_vm3, %v509_v19 }
 0x194   : > { %1389 = vmatprep.mubr.msk.bf16.mxu0 %vm1842_vm0, %v1841_v1 }
 0x195   : > { %869 = vrot.lane.b32.xlu1 %v509_v19, %s1845_s11  ;;  %871 = vrot.lane.b32.xlu0 %v2160_v18, %s1845_s11  ;;  %s1112_s11 = sshll.u32 %s2199_s18, 4  ;;  %s2240_s11 = int_to_ptr.vmem [resolvable:$true] %s1112_s11 }
 0x196   : > { %s1706_s14 = scalar_lea.vmem %s2240_s11, 256 }
 0x197   : > { %p1707_p10 = scmp.ne.s32.totalorder %s2240_s11, %s1706_s14 }
 0x199   : > { %p1708_p13 = pnand %p1707_p10, %p2353_p11 }
 0x19b   : > { %p1709_p2 = pneg %p1708_p13 }
 0x1ff   : > { %v636_v20 = vpop.permute.xlu0 %635  ;;  %v754_v22 = vpop.permute.xlu1 %753 }
 0x200   : > { %v641_v21 = vsel %vm513_vm3, %v636_v20, 0  ;;  %v759_v24 = vsel %vm513_vm3, %v754_v22, 0 }
 0x201   : > { %1388 = vmatpush3.bf16.xpose.msra.mxu0 %v641_v21 }
 0x202   : > { %1399 = vmatprep.subr.bf16.mxu0 %v1841_v1 }
 0x203   : > { %v634_v23 = vpop.permute.xlu0 %633  ;;  %v752_v26 = vpop.permute.xlu1 %751 }
 0x207   : > { %v872_v25 = vpop.permute.xlu0 %871  ;;  %v870_v28 = vpop.permute.xlu1 %869 }
 0x208   : > { %1390 = vmatmul.mubr.msk.bf16.vlgmr.msra.gmra.mrb[8].mxu0 %vm513_vm3, %v634_v23  ;;  %v877_v27 = vsel %vm513_vm3, %v872_v25, 0 }
 0x209   : > { %1400 = vmatpush3.bf16.xpose.msra.mxu0 %v759_v24  ;;  %1401 = vmatprep.mubr.msk.bf16.mxu0 %vm1842_vm0, %v1841_v1 }
 0x20a   : > { %1411 = vmatprep.subr.bf16.mxu0 %v1841_v1 }
 0x210   : > { %1402 = vmatmul.mubr.msk.bf16.vlgmr.msra.gmra.mrb[12].mxu0 %vm513_vm3, %v752_v26 }
 0x211   : > { %1412 = vmatpush3.bf16.xpose.msra.mxu0 %v877_v27  ;;  %1413 = vmatprep.mubr.msk.bf16.mxu0 %vm1842_vm0, %v1841_v1 }
 0x212   : > { %1423 = vmatprep.subr.bf16.mxu0 %v1841_v1 }
 0x218   : > { %1414 = vmatmul.mubr.msk.bf16.vlgmr.msra.gmra.mrb[16].mxu0 %vm513_vm3, %v870_v28 }
 0x219   : > { %1427 = vmatprep.mubr.msk.bf16.mxu0 %vm1842_vm0, %v1841_v1 }
 0x266   : > { %v554_v30 = vpop.f32.mrb[4].mxu0 }
 0x267   : > { %v562_v31 = vmul.f32 %v561_v29, %v554_v30  ;;  %v1379_v32 = vpop.f32.mrb[5].mxu0 }
 0x268   : > { %v557_v33 = vpop.f32.mrb[6].mxu0 }
 0x269   : > { %v1380_v34 = vpop.f32.mrb[7].mxu0  ;;  %v563_v35 = vsel %vm513_vm3, %v562_v31, -inf }
 0x26a   : > { %564 = vmax.xlane.f32.xlu0 %v563_v35 }
 0x2db   : > { %v677_v36 = vpop.f32.mrb[8].mxu0 }
 0x2dc   : > { %v685_v37 = vmul.f32 %v677_v36, %v561_v29  ;;  %v1391_v38 = vpop.f32.mrb[9].mxu0 }
 0x2dd   : > { %v680_v39 = vpop.f32.mrb[10].mxu0 }
 0x2de   : > { %v1392_v40 = vpop.f32.mrb[11].mxu0  ;;  %v686_v41 = vsel %vm513_vm3, %v685_v37, -inf }
 0x2df   : > { %687 = vmax.xlane.f32.xlu1 %v686_v41  ;;  %v1561_v40 = vld [vmem:[#allocation11] sm:$0xff]  }
 0x2e0   : > { %1424 = vmatpush3.bf16.msra.mxu0 %v1561_v40 }
 0x2e1   : > { %1425 = vmatprep.subr.bf16.mxu0 %v1841_v1 }
 0x2e3   : > { %v795_v42 = vpop.f32.mrb[12].mxu0 }
 0x2e4   : > { %v803_v43 = vmul.f32 %v795_v42, %v561_v29  ;;  %v1403_v44 = vpop.f32.mrb[13].mxu0  ;;  %v1850_v42 = vmov -1.0  }
 0x2e5   : > { %v798_v45 = vpop.f32.mrb[14].mxu0 }
 0x2e6   : > { %v1404_v46 = vpop.f32.mrb[15].mxu0  ;;  %v804_v47 = vsel %vm513_vm3, %v803_v43, -inf  ;;  %v1562_v45 = vld [vmem:[#allocation11 + $0x8] sm:$0xff]  }
 0x2e7   : > { %805 = vmax.xlane.f32.xlu0 %v804_v47  ;;  %1426 = vmatpush3.bf16.msra.mxu0 %v1562_v45 }
 0x2eb   : > { %v913_v48 = vpop.f32.mrb[16].mxu0 }
 0x2ec   : > { %v921_v49 = vmul.f32 %v913_v48, %v561_v29  ;;  %v1415_v50 = vpop.f32.mrb[17].mxu0 }
 0x2ed   : > { %v916_v51 = vpop.f32.mrb[18].mxu0 }
 0x2ee   : > { %v1416_v52 = vpop.f32.mrb[19].mxu0  ;;  %v922_v53 = vsel %vm513_vm3, %v921_v49, -inf }
 0x2ef   : > { %923 = vmax.xlane.f32.xlu0 %v922_v53 }
 0x2f7   : > { %v565_v54 = vpop.xlane.xlu0 %564 }
 0x2f8   : > { %v566_v55 = vsub.f32 %v562_v31, %v565_v54 }
 0x2fa   : > { %v567_v56 = vmul.f32 1.442695, %v566_v55 }
 0x2fc   : > { %1563 = vpow2.f32 %v567_v56 }
 0x306   : > { %v1564_v57 = vpop.eup %1563 }
 0x307   : > { %v569_v58 = vsel %vm513_vm3, %v1564_v57, 0.0 }
 0x308   : > { %570 = vadd.xlane.f32.xlu1 %v569_v58 }
 0x319   : > { %580 = vrot.lane.b32.xlu1 %v2160_v18, %s1846_s9 }
 0x36c   : > { %v688_v59 = vpop.xlane.xlu1 %687 }
 0x36d   : > { %v689_v60 = vsub.f32 %v685_v37, %v688_v59 }
 0x36f   : > { %v690_v61 = vmul.f32 1.442695, %v689_v60 }
 0x371   : > { %1565 = vpow2.f32 %v690_v61 }
 0x374   : > { %v806_v62 = vpop.xlane.xlu0 %805 }
 0x375   : > { %v807_v63 = vsub.f32 %v803_v43, %v806_v62 }
 0x377   : > { %v808_v0 = vmul.f32 1.442695, %v807_v63 }
 0x379   : > { %1567 = vpow2.f32 %v808_v0 }
 0x37b   : > { %v1566_v2 = vpop.eup %1565 }
 0x37c   : > { %v924_v3 = vpop.xlane.xlu0 %923  ;;  %v692_v4 = vsel %vm513_vm3, %v1566_v2, 0.0 }
 0x37d   : > { %v925_v5 = vsub.f32 %v921_v49, %v924_v3  ;;  %693 = vadd.xlane.f32.xlu0 %v692_v4 }
 0x37f   : > { %v926_v6 = vmul.f32 1.442695, %v925_v5 }
 0x381   : > { %1569 = vpow2.f32 %v926_v6 }
 0x383   : > { %v1568_v7 = vpop.eup %1567 }
 0x384   : > { %v810_v8 = vsel %vm513_vm3, %v1568_v7, 0.0 }
 0x385   : > { %811 = vadd.xlane.f32.xlu1 %v810_v8 }
 0x38b   : > { %v1570_v9 = vpop.eup %1569 }
 0x38c   : > { %v928_v10 = vsel %vm513_vm3, %v1570_v9, 0.0 }
 0x38d   : > { %929 = vadd.xlane.f32.xlu0 %v928_v10 }
 0x395   : > { %v571_v11 = vpop.xlane.xlu1 %570 }
 0x396   : > { %1571 = vrcp.f32 %v571_v11  ;;  %818 = vrot.lane.b32.xlu1 %v2160_v18, %s1847_s27  ;;  %s2238_s27 = scalar_lea.hbm %s2332_s6, %s1333_s7 }
 0x399   : > { %v581_v12 = vpop.permute.xlu1 %580 }
 0x39a   : > { %v587_v13 = vsel %vm585_vm4, %v581_v12, 0  ;;  %936 = vrot.lane.b32.xlu1 %v2160_v18, %s1848_s19  ;;  %s1082_s19 = scalar_lea.sflag [#allocation15], %s2127_s0 }
 0x39b   : > { %1382 = vmatpush3.bf16.msra.mxu1 %v587_v13 }
 0x39c   : > { %1393 = vmatprep.subr.bf16.mxu1 %v1841_v1 }
 0x3a0   : > { %v1572_v14 = vpop.eup %1571 }
 0x3a1   : > { %v573_v15 = vmul.f32 %v1572_v14, %v1564_v57 }
 0x3a3   : > { %700 = vrot.lane.b32.xlu0 %v2160_v18, %s1849_s8  ;;  %v574_v16 = vpack.c.bf16 %v573_v15, %v573_v15  ;;  %s1854_s8 = smov [#allocation14]  }
 0x3a5   : > { %576 = vst.msk [vmem:[%s2199_s18] sm:$0xf] %vm575_vm5, %v574_v16  ;;  %1384 = vmatmul.mubr.msk.bf16.vlgmr.msra.gmra.mrb[4].mxu1 %vm513_vm3, %v574_v16 }
 0x3a6   : > { %1395 = vmatprep.mubr.msk.bf16.mxu1 %vm1842_vm0, %v1841_v1 }
 0x40a   : > { %v694_v17 = vpop.xlane.xlu0 %693 }
 0x40b   : > { %1573 = vrcp.f32 %v694_v17 }
 0x412   : > { %v812_v19 = vpop.xlane.xlu1 %811 }
 0x413   : > { %1575 = vrcp.f32 %v812_v19 }
 0x415   : > { %v1574_v20 = vpop.eup %1573 }
 0x416   : > { %v696_v21 = vmul.f32 %v1574_v20, %v1566_v2  ;;  %v819_v27 = vpop.permute.xlu1 %818 }
 0x417   : > { %v824_v29 = vsel %vm585_vm4, %v819_v27, 0 }
 0x418   : > { %v697_v18 = vpack.c.bf16 %v696_v21, %v696_v21 }
 0x41a   : > { %v930_v22 = vpop.xlane.xlu0 %929  ;;  %1314 = vst.msk [vmem:[%s2199_s18 + $0x4] sm:$0xf] %vm575_vm5, %v697_v18  ;;  %v937_v32 = vpop.permute.xlu1 %936 }
 0x41b   : > { %1577 = vrcp.f32 %v930_v22  ;;  %v942_v34 = vsel %vm585_vm4, %v937_v32, 0 }
 0x41d   : > { %v1576_v23 = vpop.eup %1575 }
 0x41e   : > { %v814_v24 = vmul.f32 %v1576_v23, %v1568_v7  ;;  %v701_v25 = vpop.permute.xlu0 %700 }
 0x41f   : > { %v706_v26 = vsel %vm585_vm4, %v701_v25, 0 }
 0x420   : > { %1394 = vmatpush3.bf16.msra.mxu1 %v706_v26  ;;  %v815_v28 = vpack.c.bf16 %v814_v24, %v814_v24 }
 0x421   : > { %1405 = vmatprep.subr.bf16.mxu1 %v1841_v1 }
 0x422   : > { %1317 = vst.msk [vmem:[%s2199_s18 + $0x8] sm:$0xf] %vm575_vm5, %v815_v28 }
 0x423   : > { %1396 = vmatmul.mubr.msk.bf16.vlgmr.msra.gmra.mrb[8].mxu1 %vm513_vm3, %v697_v18 }
 0x424   : > { %1406 = vmatpush3.bf16.msra.mxu1 %v824_v29  ;;  %1407 = vmatprep.mubr.msk.bf16.mxu1 %vm1842_vm0, %v1841_v1 }
 0x425   : > { %v1578_v30 = vpop.eup %1577  ;;  %1417 = vmatprep.subr.bf16.mxu1 %v1841_v1 }
 0x426   : > { %v932_v31 = vmul.f32 %v1578_v30, %v1570_v9 }
 0x428   : > { %v933_v33 = vpack.c.bf16 %v932_v31, %v932_v31 }
 0x42a   : > { %1320 = vst.msk [vmem:[%s2199_s18 + $0xc] sm:$0xf] %vm575_vm5, %v933_v33 }
 0x42b   : > { %1408 = vmatmul.mubr.msk.bf16.vlgmr.msra.gmra.mrb[12].mxu1 %vm513_vm3, %v815_v28 }
 0x42c   : > { %1418 = vmatpush3.bf16.msra.mxu1 %v942_v34  ;;  %1419 = vmatprep.mubr.msk.bf16.mxu1 %vm1842_vm0, %v1841_v1 }
 0x433   : > { %1420 = vmatmul.mubr.msk.bf16.vlgmr.msra.gmra.mrb[16].mxu1 %vm513_vm3, %v933_v33 }
 0x478   : > { %v623_v35 = vpop.f32.mrb[4].mxu1 }
 0x479   : > { %v1385_v36 = vpop.f32.mrb[5].mxu1  ;;  %vm629_vm9 = vcmp.ge.f32.partialorder %v623_v35, 0.0 }
 0x47a   : > { %v626_v37 = vpop.f32.mrb[6].mxu1  ;;  %v630_v60 = vsel %vm629_vm9, 1.0, %v1850_v42 }
 0x47b   : > { %v1386_v38 = vpop.f32.mrb[7].mxu1  ;;  %v631_v62 = vpack.c.bf16 %v630_v60, %v630_v60 }
 0x4f6   : > { %v742_v39 = vpop.f32.mrb[8].mxu1 }
 0x4f7   : > { %vm748_vm6 = vcmp.ge.f32.partialorder %v742_v39, 0.0  ;;  %v1397_v41 = vpop.f32.mrb[9].mxu1 }
 0x4f8   : > { %v749_v43 = vsel %vm748_vm6, 1.0, %v1850_v42  ;;  %v745_v44 = vpop.f32.mrb[10].mxu1 }
 0x4f9   : > { %v750_v46 = vpack.c.bf16 %v749_v43, %v749_v43  ;;  %v1398_v47 = vpop.f32.mrb[11].mxu1 }
 0x4fb   : > { %988 = vrot.lane.b32.xlu0 %v750_v46, %s1851_s29  ;;  %s1710_s29 = sshll.u32 %s1854_s8, 4  ;;  %s1711_s29 = int_to_ptr.vmem [resolvable:$false] %s1710_s29 }
 0x4fc   : > { %s1712_s18 = scalar_lea.vmem %s1711_s29, 512  ;;  %p1713_p4 = scmp.lt.s32.totalorder %s2240_s11, %s1711_s29 }
 0x4fd   : > { %p1714_p12 = scmp.lt.s32.totalorder %s1712_s18, %s1706_s14 }
 0x4fe   : > { %v860_v48 = vpop.f32.mrb[12].mxu1 }
 0x4ff   : > { %vm866_vm7 = vcmp.ge.f32.partialorder %v860_v48, 0.0  ;;  %v1409_v49 = vpop.f32.mrb[13].mxu1  ;;  %p1715_p0 = por %p1714_p12, %p1713_p4 }
 0x500   : > { %v867_v50 = vsel %vm866_vm7, 1.0, %v1850_v42  ;;  %v863_v51 = vpop.f32.mrb[14].mxu1 }
 0x501   : > { %v868_v52 = vpack.c.bf16 %v867_v50, %v867_v50  ;;  %v1410_v53 = vpop.f32.mrb[15].mxu1  ;;  %p1716_p1 = pnand %p1715_p0, %p1709_p2 }
 0x503   : > { %991 = vrot.lane.b32.xlu1 %v868_v52, %s1852_s10 }
 0x506   : > { %v978_v54 = vpop.f32.mrb[16].mxu1 }
 0x507   : > { %vm984_vm8 = vcmp.ge.f32.partialorder %v978_v54, 0.0  ;;  %v1421_v55 = vpop.f32.mrb[17].mxu1 }
 0x508   : > { %v985_v56 = vsel %vm984_vm8, 1.0, %v1850_v42  ;;  %v981_v57 = vpop.f32.mrb[18].mxu1 }
 0x509   : > { %v986_v58 = vpack.c.bf16 %v985_v56, %v985_v56  ;;  %v1422_v59 = vpop.f32.mrb[19].mxu1 }
 0x50b   : > { %994 = vrot.lane.b32.xlu0 %v986_v58, %s1853_s30 }
 0x56d   : > { %v989_v61 = vpop.permute.xlu0 %988 }
 0x56e   : > { %v998_v63 = vsel %vm513_vm3, %v631_v62, %v989_v61 }
 0x575   : > { %v992_v1 = vpop.permute.xlu1 %991 }
 0x576   : > { %v1001_v0 = vsel %vm999_vm10, %v998_v63, %v992_v1 }
 0x57d   : > { %v995_v2 = vpop.permute.xlu0 %994 }
 0x57e   : > { %v1004_v3 = vsel %vm1002_vm11, %v1001_v0, %v995_v2 }
 0x57f   : > { %1428 = vmatmul.mubr.msk.bf16.vlgmr.msra.gmra.mrb[20].mxu0 %vm385_vm1, %v1004_v3 }
 0x580   : > { %1719 = shalt.err (!%p1716_p1)
}
 0x581   : > { %s1720_s12 = scalar_lea.hbm %s2238_s27, 256  ;;  %s1724_s7 = scalar_lea.hbm %s2332_s6, 512 }
 0x582   : > { %p1721_p8 = scmp.ne.s32.totalorder %s2238_s27, %s1720_s12  ;;  %p1725_p9 = scmp.lt.u32.totalorder %s2238_s27, %s2332_s6 }
 0x583   : > { %p1726_p7 = scmp.lt.u32.totalorder %s1724_s7, %s1720_s12  ;;  %p1728_p10 = scmp.lt.u32.totalorder %s1720_s12, %s2238_s27 }
 0x584   : > { %p1722_p5 = pnand %p1721_p8, %p2353_p11 }
 0x585   : > { %p1727_p3 = por %p1726_p7, %p1725_p9 }
 0x586   : > { %p1723_p6 = pneg %p1722_p5 }
 0x587   : > { %p1729_p13 = por %p1728_p10, %p1727_p3 }
 0x589   : > { %p1730_p2 = pnand %p1729_p13, %p1723_p6 }
 0x58b   : > { %1733 = shalt.err (!%p1730_p2)
}
 0x58c   : > { %s1855_s14 = smov 64   ;;  %s1856_s8 = smov 4   ;;  %v1005_v4 = vld [vmem:[%s2226_s20] sm:$0xff] }
 0x58d   : > { %1450 = dma.vmem_to_hbm [thread:$0]  (%p2353_p11), %s2240_s11, 256, %s2238_s27, %s1082_s19, %s1855_s14, %s1855_s14, %s1856_s8  }
 0x58e   : > { %s1325_s29 = sld [smem:[#allocation3 + $0x1]]  ;;  %s1328_s18 = sshll.u32 %s1824_s24, 7 }
 0x58f   : > { %s1096_s12 = sshll.u32 %s2226_s20, 4  ;;  %s2275_s11 = scalar_lea.hbm %s2331_s5, %s1328_s18  ;;  %s2277_s12 = int_to_ptr.vmem [resolvable:$true] %s1096_s12 }
 0x590   : > { %s1077_s27 = scalar_lea.sflag [#allocation5], %s2127_s0  ;;  %s1734_s19 = scalar_lea.vmem %s2277_s12, 128 }
 0x591   : > { %p1735_p4 = scmp.ne.s32.totalorder %s2277_s12, %s1734_s19  ;;  %s1857_s24 = smov [#allocation13]  }
 0x592   : > { %s1738_s7 = sshll.u32 %s1857_s24, 4  ;;  %s1739_s7 = int_to_ptr.vmem [resolvable:$false] %s1738_s7 }
 0x593   : > { %p1736_p12 = pnand %p1735_p4, %p2353_p11  ;;  %s1740_s28 = scalar_lea.vmem %s1739_s7, 256 }
 0x594   : > { %v1073_v10 = vstv %s1325_s29  ;;  %p1741_p1 = scmp.lt.s32.totalorder %s2277_s12, %s1739_s7  ;;  %p1742_p8 = scmp.lt.s32.totalorder %s1740_s28, %s1734_s19 }
 0x595   : > { %p1737_p0 = pneg %p1736_p12 }
 0x596   : > { %p1743_p5 = por %p1742_p8, %p1741_p1 }
 0x598   : > { %p1744_p6 = pnand %p1743_p5, %p1737_p0 }
 0x652   : > { %v1060_v5 = vpop.f32.mrb[20].mxu0 }
 0x653   : > { %v1066_v6 = vadd.f32 %v1060_v5, %v1005_v4  ;;  %v1429_v7 = vpop.f32.mrb[21].mxu0 }
 0x654   : > { %v1063_v8 = vpop.f32.mrb[22].mxu0 }
 0x655   : > { %1067 = vst.msk [vmem:[%s2226_s20] sm:$0xff] %vm385_vm1, %v1066_v6  ;;  %v1430_v9 = vpop.f32.mrb[23].mxu0 }
 0x65c   : > { %v1071_v11 = vld [vmem:[%s2226_s20] sm:$0xff] }
 0x65d   : > { %v1074_v12 = vmul.f32 %v1073_v10, %v1071_v11 }
 0x65f   : > { %1075 = vst.msk [vmem:[%s2226_s20] sm:$0xff] %vm385_vm1, %v1074_v12 }
 0x660   : > { %1747 = shalt.err (!%p1744_p6)
}
 0x661   : > { %s1748_s0 = scalar_lea.hbm %s2275_s11, 128  ;;  %s1752_s14 = scalar_lea.hbm %s2331_s5, 256 }
 0x662   : > { %p1749_p9 = scmp.ne.s32.totalorder %s2275_s11, %s1748_s0  ;;  %p1753_p10 = scmp.lt.u32.totalorder %s2275_s11, %s2331_s5 }
 0x663   : > { %p1754_p13 = scmp.lt.u32.totalorder %s1752_s14, %s1748_s0  ;;  %p1756_p4 = scmp.lt.u32.totalorder %s1748_s0, %s2275_s11 }
 0x664   : > { %p1750_p7 = pnand %p1749_p9, %p2353_p11 }
 0x665   : > { %p1755_p2 = por %p1754_p13, %p1753_p10 }
 0x666   : > { %p1751_p3 = pneg %p1750_p7 }
 0x667   : > { %p1757_p12 = por %p1756_p4, %p1755_p2 }
 0x669   : > { %p1758_p0 = pnand %p1757_p12, %p1751_p3 }
 0x66b   : > { %1761 = shalt.err (!%p1758_p0)
}
 0x66c   : > { %1449 = dma.vmem_to_hbm [thread:$0]  (%p2353_p11), %s2277_s12, 128, %s2275_s11, %s1077_s27  }
 0x66d PF: > { %s1127_s18 = sand.u32 1, %s1812_s21   ;;  %p2354_p1 = scmp.ne.s32.totalorder %s2349_s17, 0 }
 0x66e   : > { %p2355_p8 = scmp.ge.s32.totalorder %s1832_s26, 2  ;;  %s1128_s10 = scalar_lea.sflag [#allocation5], %s1127_s18 }
 0x670   : > { %p1471_p5 = pnand %p2355_p8, %p2354_p1 }
 0x672   : > { %1803 = dma.done.wait (!%p1471_p5), %s1128_s10, 128  }
 0x673   : > { %1805 = vsyncadd (!%p1471_p5), %s1128_s10, 4294967168  ;;  %s1137_s30 = scalar_lea.sflag [#allocation15], %s1127_s18 }
 0x674   : > { %1807 = dma.done.wait (!%p1471_p5), %s1137_s30, 256  }
 0x675   : > { %1809 = vsyncadd (!%p1471_p5), %s1137_s30, 4294967040  ;;  %s29_s26 = sadd.s32 1, %s1832_s26   ;;  %s2356_s21 = smov %s1816_s22 }
 0x676   : > { %p26_p6 = scmp.ge.s32.totalorder %s29_s26, 4   ;;  %s2357_s22 = smov %s1820_s23 }
 0x677   : > { %s2358_s23 = smov %s2073_s15  ;;  %s2359_s24 = smov %s1828_s25 }
 0x678   : > { %s2360_s25 = smov %s2362_s16  ;;  %28 = sbr.rel (!%p26_p6) target bundleno = 13 (0xd), region = 140 }
 0x67f   :  { %1142 = vsyncpa [#allocation4], 1 }
 0x680   :  { %1144 = vsyncpa [#allocation4 + $0x1], 1 }
 0x681   :  { %1145 = vsyncpa [#allocation9], 1 }
 0x682   :  { %1146 = vsyncpa [#allocation12], 1 }
 0x683   :  { %1147 = vsyncpa [#allocation5], 1 }
 0x684   :  { %1149 = vsyncpa [#allocation5 + $0x1], 1 }
 0x685   :  { %1150 = vsyncpa [#allocation15], 1 }
 0x686   :  { %1152 = vsyncpa [#allocation15 + $0x1], 1 }
 0x687   :  { %1153 = vsyncpa [#allocation6], 1 }
 0x688   :  { %1155 = vsyncpa [#allocation6 + $0x1], 1 }

</bundles_post_ra>
